<compile_context>
chip_gen: v7x
topology: tpu7x:2x2x1
jax: 0.10.0
libtpu: 0.0.40
codegen_flags: <defaults>
</compile_context>

<pallas_src>
import functools

import numpy as np
import jax
import jax.numpy as jnp
from jax.experimental import pallas as pl
from jax.experimental.pallas import tpu as pltpu


def _stft_loss_kernel(xf_ref, yf_ref, basis_ref, alt_ref,
                      od_ref, oy_ref, oa_ref,
                      acc_d, acc_y, acc_a,
                      *, tm, tps, n_valid, half):
    s = pl.program_id(0)          # parallel slice (megacore)
    i = pl.program_id(1)          # reduction step over row tiles

    @pl.when(i == 0)
    def _():
        acc_d[...] = jnp.zeros_like(acc_d)
        acc_y[...] = jnp.zeros_like(acc_y)
        acc_a[...] = jnp.zeros_like(acc_a)

    xf = xf_ref[...]              # (tm, n_fft) bf16, raw frames
    yf = yf_ref[...]              # (tm, n_fft) bf16
    basis = basis_ref[...]        # (n_fft, 2*half) bf16, windowed [cos | sin]
    alt = alt_ref[...]            # (1, n_fft) f32, windowed Nyquist (-1)^t row

    # Windowed one-sided DFT (bins 0..half-1) on the MXU, f32 accumulation.
    zx = jnp.dot(xf, basis, preferred_element_type=jnp.float32)   # (tm, 2*half)
    zy = jnp.dot(yf, basis, preferred_element_type=jnp.float32)

    x_sq = jnp.maximum(zx[:, :half] * zx[:, :half] + zx[:, half:] * zx[:, half:],
                       1e-6)
    y_sq = jnp.maximum(zy[:, :half] * zy[:, :half] + zy[:, half:] * zy[:, half:],
                       1e-6)

    # Nyquist bin: real part only, via VPU multiply + XLU lane reduce (f32).
    x_ny = jnp.sum(xf * alt, axis=-1, keepdims=True)              # (tm, 1)
    y_ny = jnp.sum(yf * alt, axis=-1, keepdims=True)
    x_nys = jnp.maximum(x_ny * x_ny, 1e-6)
    y_nys = jnp.maximum(y_ny * y_ny, 1e-6)

    x_mag = jnp.sqrt(x_sq)
    y_mag = jnp.sqrt(y_sq)
    x_nym = jnp.sqrt(x_nys)
    y_nym = jnp.sqrt(y_nys)

    diff = y_mag - x_mag
    d_ny = y_nym - x_nym

    # Row-validity mask: zero-padded rows give identical x/y magnitudes, so
    # only the ||y||^2 term needs masking (diff and log-diff are already 0).
    row0 = (s * tps + i) * tm
    rows = jax.lax.broadcasted_iota(jnp.int32, (tm, 1), 0) + row0
    valid = (rows < n_valid).astype(jnp.float32)                  # (tm, 1)

    ssd = (jnp.sum(diff * diff, keepdims=True)
           + jnp.sum(d_ny * d_ny, keepdims=True))
    ssy = (jnp.sum(y_sq * valid, keepdims=True)
           + jnp.sum(y_nys * valid, keepdims=True))
    # |log(y_mag) - log(x_mag)| == 0.5 * |log(y_sq) - log(x_sq)|
    sab = 0.5 * (jnp.sum(jnp.abs(jnp.log(y_sq) - jnp.log(x_sq)), keepdims=True)
                 + jnp.sum(jnp.abs(jnp.log(y_nys) - jnp.log(x_nys)),
                           keepdims=True))

    acc_d[...] += ssd
    acc_y[...] += ssy
    acc_a[...] += sab

    @pl.when(i == pl.num_programs(1) - 1)
    def _():
        od_ref[...] = acc_d[...].reshape(1, 1, 1)
        oy_ref[...] = acc_y[...].reshape(1, 1, 1)
        oa_ref[...] = acc_a[...].reshape(1, 1, 1)


class STFTLossPallas:
    """JAX/Pallas equivalent of STFTLoss.forward (spectral conv + log-mag)."""

    NUM_SLICES = 2          # max "parallel" grid slices (v7x megacore)
    MAX_TM = 1024           # rows per tile; also capped by a VMEM budget below

    def __init__(self, fft_size=256, shift_size=64, win_length=192):
        assert win_length <= fft_size
        assert fft_size % 256 == 0, "need fft_size multiple of 256 for lane-aligned halves"
        self.fft_size = fft_size
        self.shift_size = shift_size
        self.win_length = win_length

        half = fft_size // 2
        self.half = half
        self.n_bins = half + 1

        # torch.hann_window(win_length) (periodic), centered in n_fft like torch.stft.
        n = np.arange(win_length)
        win = 0.5 - 0.5 * np.cos(2.0 * np.pi * n / win_length)
        lpad = (fft_size - win_length) // 2
        w = np.zeros(fft_size, dtype=np.float64)
        w[lpad:lpad + win_length] = win

        # Windowed one-sided DFT bases for bins 0..half-1, fused [cos | sin].
        t = np.arange(fft_size)[:, None]
        k = np.arange(half)[None, :]
        ang = 2.0 * np.pi * t * k / fft_size
        cos_w = w[:, None] * np.cos(ang)
        sin_w = w[:, None] * np.sin(ang)   # sign irrelevant for |.|
        self.basis = jnp.asarray(np.concatenate([cos_w, sin_w], axis=1),
                                 dtype=jnp.bfloat16)              # (n_fft, n_fft)

        # Windowed Nyquist row: w[t] * (-1)^t  (bin k = half has sin == 0).
        alt = w * np.cos(np.pi * np.arange(fft_size))
        self.alt = jnp.asarray(alt[None, :], dtype=jnp.float32)   # (1, n_fft)

    def _frames(self, x):
        """x: (B, T) -> raw (un-windowed) frames (B*num_frames, n_fft) bf16."""
        B, T = x.shape
        pad = self.fft_size // 2
        # Cast before pad/gather: identical values, half the gather read traffic.
        xp = jnp.pad(x.astype(jnp.bfloat16), ((0, 0), (pad, pad)), mode="reflect")
        num_frames = 1 + T // self.shift_size
        idx = (jnp.arange(num_frames)[:, None] * self.shift_size
               + jnp.arange(self.fft_size)[None, :])              # (F, n_fft)
        framed = xp[:, idx]                                       # (B, F, n_fft)
        return framed.reshape(B * num_frames, self.fft_size)

    def __call__(self, x, y):
        n_fft = self.fft_size
        half = self.half

        xf = self._frames(x)
        yf = self._frames(y)
        n_rows = xf.shape[0]

        # Row tiling: TM rows per grid step, num_slices parallel slices.
        # Cap TM so double-buffered x/y frame tiles stay within ~8 MiB of VMEM.
        tm_vmem_cap = max(8, ((1 << 20) // n_fft) // 8 * 8)
        tm = min(self.MAX_TM, tm_vmem_cap, ((n_rows + 7) // 8) * 8)
        n_tiles = -(-n_rows // tm)
        num_slices = min(self.NUM_SLICES, n_tiles)
        tps = -(-n_tiles // num_slices)                # tiles per slice
        n_pad = num_slices * tps * tm
        if n_pad > n_rows:
            pad_rows = ((0, n_pad - n_rows), (0, 0))
            xf = jnp.pad(xf, pad_rows)
            yf = jnp.pad(yf, pad_rows)

        kernel = functools.partial(_stft_loss_kernel,
                                   tm=tm, tps=tps, n_valid=n_rows, half=half)

        frame_spec = pl.BlockSpec((tm, n_fft), lambda s, i: (s * tps + i, 0))
        out_spec = pl.BlockSpec((1, 1, 1), lambda s, i: (s, 0, 0))
        out_shape = jax.ShapeDtypeStruct((num_slices, 1, 1), jnp.float32)

        cost = pl.CostEstimate(
            flops=4 * n_pad * n_fft * n_fft,                 # two (tm,K)@(K,K) matmuls
            transcendentals=4 * n_pad * (half + 1),          # sqrt + log, x and y
            bytes_accessed=2 * n_pad * n_fft * 2 + n_fft * n_fft * 2 + n_fft * 4,
        )

        od, oy, oa = pl.pallas_call(
            kernel,
            out_shape=(out_shape, out_shape, out_shape),
            grid_spec=pltpu.PrefetchScalarGridSpec(
                num_scalar_prefetch=0,
                grid=(num_slices, tps),
                in_specs=[
                    frame_spec,                                        # xf
                    frame_spec,                                        # yf
                    pl.BlockSpec((n_fft, n_fft), lambda s, i: (0, 0)),  # fused basis
                    pl.BlockSpec((1, n_fft), lambda s, i: (0, 0)),      # nyquist row
                ],
                out_specs=(out_spec, out_spec, out_spec),
                scratch_shapes=[pltpu.VMEM((1, 1), jnp.float32)] * 3,
            ),
            compiler_params=pltpu.CompilerParams(
                dimension_semantics=("parallel", "arbitrary"),
                vmem_limit_bytes=32 * 1024 * 1024,
            ),
            cost_estimate=cost,
        )(xf, yf, self.basis, self.alt)

        sum_sq_diff = jnp.sum(od)
        sum_sq_y = jnp.sum(oy)
        sum_abs = jnp.sum(oa)

        sc_loss = jnp.sqrt(sum_sq_diff / sum_sq_y)
        mag_loss = sum_abs / float(n_rows * self.n_bins)
        return sc_loss, mag_loss


if __name__ == "__main__":
    # Deterministic small example consistent with STFTLoss.forward(x, y):
    # x, y are (B, T) waveforms.
    key = jax.random.PRNGKey(0)
    kx, ky = jax.random.split(key)
    B, T = 2, 1024
    x = jax.random.normal(kx, (B, T), dtype=jnp.float32)
    y = jax.random.normal(ky, (B, T), dtype=jnp.float32)

    loss_mod = STFTLossPallas(fft_size=256, shift_size=64, win_length=192)
    loss_fn = jax.jit(loss_mod.__call__)
    sc_loss, mag_loss = loss_fn(x, y)
    jax.block_until_ready((sc_loss, mag_loss))
    assert np.isfinite(float(sc_loss)) and np.isfinite(float(mag_loss))
    print("KERNEL_OK")
</pallas_src>

<mosaic_0001>
module attributes {stable_mosaic.version = 11 : i64} {
  func.func @_stft_loss_kernel(%arg0: i32, %arg1: i32, %arg2: memref<40x256xbf16, #tpu.memory_space<vmem>>, %arg3: memref<40x256xbf16, #tpu.memory_space<vmem>>, %arg4: memref<256x256xbf16, #tpu.memory_space<vmem>>, %arg5: memref<1x256xf32, #tpu.memory_space<vmem>>, %arg6: memref<1x1x1xf32, #tpu.memory_space<vmem>>, %arg7: memref<1x1x1xf32, #tpu.memory_space<vmem>>, %arg8: memref<1x1x1xf32, #tpu.memory_space<vmem>>, %arg9: memref<1x1xf32, #tpu.memory_space<vmem>>, %arg10: memref<1x1xf32, #tpu.memory_space<vmem>>, %arg11: memref<1x1xf32, #tpu.memory_space<vmem>>) attributes {dimension_semantics = [#tpu.dimension_semantics<parallel>, #tpu.dimension_semantics<arbitrary>], iteration_bounds = array<i64: 1, 1>, scalar_prefetch = 0 : i64, scratch_operands = 3 : i64, tpu.core_type = #tpu.core_type<tc>, window_params = [{transform_indices = @transform_0, window_bounds = array<i64: 40, 256>}, {transform_indices = @transform_1, window_bounds = array<i64: 40, 256>}, {pipeline_mode = #tpu.pipeline_mode<synchronous>, transform_indices = @transform_2, window_bounds = array<i64: 256, 256>}, {pipeline_mode = #tpu.pipeline_mode<synchronous>, transform_indices = @transform_3, window_bounds = array<i64: 1, 256>}, {transform_indices = @transform_4, window_bounds = array<i64: 1, 1, 1>}, {transform_indices = @transform_5, window_bounds = array<i64: 1, 1, 1>}, {transform_indices = @transform_6, window_bounds = array<i64: 1, 1, 1>}]} {
    %c0_i32 = arith.constant 0 : i32
    %0 = arith.cmpi eq, %arg1, %c0_i32 : i32
    %1 = arith.extui %0 : i1 to i32
    %c0_i32_0 = arith.constant 0 : i32
    %2 = arith.cmpi ne, %1, %c0_i32_0 : i32
    scf.if %2 {
      %cst_36 = arith.constant 0.000000e+00 : f32
      %119 = vector.broadcast %cst_36 : f32 to vector<1x1xf32>
      %c0_37 = arith.constant 0 : index
      %c0_38 = arith.constant 0 : index
      %120 = vector.load %arg9[%c0_37, %c0_38] : memref<1x1xf32, #tpu.memory_space<vmem>>, vector<1x1xf32>
      tpu.vector_store %arg9[%c0_37, %c0_38], %119 {strides = array<i32>} : memref<1x1xf32, #tpu.memory_space<vmem>>, vector<1x1xf32>,
      %cst_39 = arith.constant 0.000000e+00 : f32
      %121 = vector.broadcast %cst_39 : f32 to vector<1x1xf32>
      %c0_40 = arith.constant 0 : index
      %c0_41 = arith.constant 0 : index
      %122 = vector.load %arg10[%c0_40, %c0_41] : memref<1x1xf32, #tpu.memory_space<vmem>>, vector<1x1xf32>
      tpu.vector_store %arg10[%c0_40, %c0_41], %121 {strides = array<i32>} : memref<1x1xf32, #tpu.memory_space<vmem>>, vector<1x1xf32>,
      %cst_42 = arith.constant 0.000000e+00 : f32
      %123 = vector.broadcast %cst_42 : f32 to vector<1x1xf32>
      %c0_43 = arith.constant 0 : index
      %c0_44 = arith.constant 0 : index
      %124 = vector.load %arg11[%c0_43, %c0_44] : memref<1x1xf32, #tpu.memory_space<vmem>>, vector<1x1xf32>
      tpu.vector_store %arg11[%c0_43, %c0_44], %123 {strides = array<i32>} : memref<1x1xf32, #tpu.memory_space<vmem>>, vector<1x1xf32>,
    } else {
    }
    %c0 = arith.constant 0 : index
    %c0_1 = arith.constant 0 : index
    %3 = vector.load %arg2[%c0, %c0_1] : memref<40x256xbf16, #tpu.memory_space<vmem>>, vector<40x256xbf16>
    %c0_2 = arith.constant 0 : index
    %c0_3 = arith.constant 0 : index
    %4 = vector.load %arg3[%c0_2, %c0_3] : memref<40x256xbf16, #tpu.memory_space<vmem>>, vector<40x256xbf16>
    %c0_4 = arith.constant 0 : index
    %c0_5 = arith.constant 0 : index
    %5 = vector.load %arg4[%c0_4, %c0_5] : memref<256x256xbf16, #tpu.memory_space<vmem>>, vector<256x256xbf16>
    %c0_6 = arith.constant 0 : index
    %c0_7 = arith.constant 0 : index
    %6 = vector.load %arg5[%c0_6, %c0_7] : memref<1x256xf32, #tpu.memory_space<vmem>>, vector<1x256xf32>
    %cst = arith.constant dense<0.000000e+00> : vector<40x256xf32>
    %7 = tpu.matmul %3, %5, %cst {dimension_numbers = #tpu.dot_dimension_numbers<[1], [0], [0], [1], [0, 0, 1, 1], [], []>} : vector<40x256xbf16>, vector<256x256xbf16>, vector<40x256xf32> -> vector<40x256xf32>
    %cst_8 = arith.constant dense<0.000000e+00> : vector<40x256xf32>
    %8 = tpu.matmul %4, %5, %cst_8 {dimension_numbers = #tpu.dot_dimension_numbers<[1], [0], [0], [1], [0, 0, 1, 1], [], []>} : vector<40x256xbf16>, vector<256x256xbf16>, vector<40x256xf32> -> vector<40x256xf32>
    %9 = vector.extract_strided_slice %7 {offsets = [0, 0], sizes = [40, 128], strides = [1, 1]} : vector<40x256xf32> to vector<40x128xf32>
    %10 = vector.extract_strided_slice %7 {offsets = [0, 0], sizes = [40, 128], strides = [1, 1]} : vector<40x256xf32> to vector<40x128xf32>
    %11 = arith.mulf %9, %10 : vector<40x128xf32>
    %12 = vector.extract_strided_slice %7 {offsets = [0, 128], sizes = [40, 128], strides = [1, 1]} : vector<40x256xf32> to vector<40x128xf32>
    %13 = vector.extract_strided_slice %7 {offsets = [0, 128], sizes = [40, 128], strides = [1, 1]} : vector<40x256xf32> to vector<40x128xf32>
    %14 = arith.mulf %12, %13 : vector<40x128xf32>
    %15 = arith.addf %11, %14 : vector<40x128xf32>
    %cst_9 = arith.constant 9.99999997E-7 : f32
    %16 = vector.broadcast %cst_9 : f32 to vector<40x128xf32>
    %17 = arith.maximumf %15, %16 : vector<40x128xf32>
    %18 = vector.extract_strided_slice %8 {offsets = [0, 0], sizes = [40, 128], strides = [1, 1]} : vector<40x256xf32> to vector<40x128xf32>
    %19 = vector.extract_strided_slice %8 {offsets = [0, 0], sizes = [40, 128], strides = [1, 1]} : vector<40x256xf32> to vector<40x128xf32>
    %20 = arith.mulf %18, %19 : vector<40x128xf32>
    %21 = vector.extract_strided_slice %8 {offsets = [0, 128], sizes = [40, 128], strides = [1, 1]} : vector<40x256xf32> to vector<40x128xf32>
    %22 = vector.extract_strided_slice %8 {offsets = [0, 128], sizes = [40, 128], strides = [1, 1]} : vector<40x256xf32> to vector<40x128xf32>
    %23 = arith.mulf %21, %22 : vector<40x128xf32>
    %24 = arith.addf %20, %23 : vector<40x128xf32>
    %cst_10 = arith.constant 9.99999997E-7 : f32
    %25 = vector.broadcast %cst_10 : f32 to vector<40x128xf32>
    %26 = arith.maximumf %24, %25 : vector<40x128xf32>
    %27 = arith.extf %3 : vector<40x256xbf16> to vector<40x256xf32>
    %28 = vector.broadcast %6 : vector<1x256xf32> to vector<40x256xf32>
    %29 = arith.mulf %27, %28 : vector<40x256xf32>
    %cst_11 = arith.constant dense<0.000000e+00> : vector<40xf32>
    %30 = vector.multi_reduction <add>, %29, %cst_11 [1] : vector<40x256xf32> to vector<40xf32>
    %31 = vector.shape_cast %30 : vector<40xf32> to vector<40x1xf32>
    %32 = arith.extf %4 : vector<40x256xbf16> to vector<40x256xf32>
    %33 = vector.broadcast %6 : vector<1x256xf32> to vector<40x256xf32>
    %34 = arith.mulf %32, %33 : vector<40x256xf32>
    %cst_12 = arith.constant dense<0.000000e+00> : vector<40xf32>
    %35 = vector.multi_reduction <add>, %34, %cst_12 [1] : vector<40x256xf32> to vector<40xf32>
    %36 = vector.shape_cast %35 : vector<40xf32> to vector<40x1xf32>
    %37 = arith.mulf %31, %31 : vector<40x1xf32>
    %cst_13 = arith.constant 9.99999997E-7 : f32
    %38 = vector.broadcast %cst_13 : f32 to vector<40x1xf32>
    %39 = arith.maximumf %37, %38 : vector<40x1xf32>
    %40 = arith.mulf %36, %36 : vector<40x1xf32>
    %cst_14 = arith.constant 9.99999997E-7 : f32
    %41 = vector.broadcast %cst_14 : f32 to vector<40x1xf32>
    %42 = arith.maximumf %40, %41 : vector<40x1xf32>
    %43 = math.sqrt %17 : vector<40x128xf32>
    %44 = math.sqrt %26 : vector<40x128xf32>
    %45 = math.sqrt %39 : vector<40x1xf32>
    %46 = math.sqrt %42 : vector<40x1xf32>
    %47 = arith.subf %44, %43 : vector<40x128xf32>
    %48 = arith.subf %46, %45 : vector<40x1xf32>
    %c1_i32 = arith.constant 1 : i32
    %49 = arith.muli %arg0, %c1_i32 : i32
    %50 = arith.addi %49, %arg1 : i32
    %c40_i32 = arith.constant 40 : i32
    %51 = arith.muli %50, %c40_i32 : i32
    %52 = tpu.iota {dimensions = array<i32: 0>} : vector<40x1xi32>
    %53 = vector.broadcast %51 : i32 to vector<40x1xi32>
    %54 = arith.addi %52, %53 : vector<40x1xi32>
    %c34_i32 = arith.constant 34 : i32
    %55 = vector.broadcast %c34_i32 : i32 to vector<40x1xi32>
    %56 = arith.cmpi slt, %54, %55 : vector<40x1xi32>
    %57 = arith.extui %56 : vector<40x1xi1> to vector<40x1xi32>
    %58 = arith.sitofp %57 : vector<40x1xi32> to vector<40x1xf32>
    %59 = arith.mulf %47, %47 : vector<40x128xf32>
    %60 = vector.shape_cast %59 : vector<40x128xf32> to vector<1x40x128xf32>
    %cst_15 = arith.constant dense<0.000000e+00> : vector<1xf32>
    %61 = vector.multi_reduction <add>, %60, %cst_15 [1, 2] : vector<1x40x128xf32> to vector<1xf32>
    %62 = vector.shape_cast %61 : vector<1xf32> to vector<1x1x1xf32>
    %63 = vector.extract %62[0, 0, 0] : f32 from vector<1x1x1xf32>
    %64 = vector.broadcast %63 : f32 to vector<1x1xf32>
    %65 = arith.mulf %48, %48 : vector<40x1xf32>
    %66 = vector.shape_cast %65 : vector<40x1xf32> to vector<1x40x1xf32>
    %cst_16 = arith.constant dense<0.000000e+00> : vector<1xf32>
    %67 = vector.multi_reduction <add>, %66, %cst_16 [1, 2] : vector<1x40x1xf32> to vector<1xf32>
    %68 = vector.shape_cast %67 : vector<1xf32> to vector<1x1x1xf32>
    %69 = vector.extract %68[0, 0, 0] : f32 from vector<1x1x1xf32>
    %70 = vector.broadcast %69 : f32 to vector<1x1xf32>
    %71 = arith.addf %64, %70 : vector<1x1xf32>
    %72 = vector.broadcast %58 : vector<40x1xf32> to vector<40x128xf32>
    %73 = arith.mulf %26, %72 : vector<40x128xf32>
    %74 = vector.shape_cast %73 : vector<40x128xf32> to vector<1x40x128xf32>
    %cst_17 = arith.constant dense<0.000000e+00> : vector<1xf32>
    %75 = vector.multi_reduction <add>, %74, %cst_17 [1, 2] : vector<1x40x128xf32> to vector<1xf32>
    %76 = vector.shape_cast %75 : vector<1xf32> to vector<1x1x1xf32>
    %77 = vector.extract %76[0, 0, 0] : f32 from vector<1x1x1xf32>
    %78 = vector.broadcast %77 : f32 to vector<1x1xf32>
    %79 = arith.mulf %42, %58 : vector<40x1xf32>
    %80 = vector.shape_cast %79 : vector<40x1xf32> to vector<1x40x1xf32>
    %cst_18 = arith.constant dense<0.000000e+00> : vector<1xf32>
    %81 = vector.multi_reduction <add>, %80, %cst_18 [1, 2] : vector<1x40x1xf32> to vector<1xf32>
    %82 = vector.shape_cast %81 : vector<1xf32> to vector<1x1x1xf32>
    %83 = vector.extract %82[0, 0, 0] : f32 from vector<1x1x1xf32>
    %84 = vector.broadcast %83 : f32 to vector<1x1xf32>
    %85 = arith.addf %78, %84 : vector<1x1xf32>
    %86 = math.log %26 : vector<40x128xf32>
    %87 = math.log %17 : vector<40x128xf32>
    %88 = arith.subf %86, %87 : vector<40x128xf32>
    %89 = math.absf %88 : vector<40x128xf32>
    %90 = vector.shape_cast %89 : vector<40x128xf32> to vector<1x40x128xf32>
    %cst_19 = arith.constant dense<0.000000e+00> : vector<1xf32>
    %91 = vector.multi_reduction <add>, %90, %cst_19 [1, 2] : vector<1x40x128xf32> to vector<1xf32>
    %92 = vector.shape_cast %91 : vector<1xf32> to vector<1x1x1xf32>
    %93 = vector.extract %92[0, 0, 0] : f32 from vector<1x1x1xf32>
    %94 = vector.broadcast %93 : f32 to vector<1x1xf32>
    %95 = math.log %42 : vector<40x1xf32>
    %96 = math.log %39 : vector<40x1xf32>
    %97 = arith.subf %95, %96 : vector<40x1xf32>
    %98 = math.absf %97 : vector<40x1xf32>
    %99 = vector.shape_cast %98 : vector<40x1xf32> to vector<1x40x1xf32>
    %cst_20 = arith.constant dense<0.000000e+00> : vector<1xf32>
    %100 = vector.multi_reduction <add>, %99, %cst_20 [1, 2] : vector<1x40x1xf32> to vector<1xf32>
    %101 = vector.shape_cast %100 : vector<1xf32> to vector<1x1x1xf32>
    %102 = vector.extract %101[0, 0, 0] : f32 from vector<1x1x1xf32>
    %103 = vector.broadcast %102 : f32 to vector<1x1xf32>
    %104 = arith.addf %94, %103 : vector<1x1xf32>
    %cst_21 = arith.constant 5.000000e-01 : f32
    %105 = vector.broadcast %cst_21 : f32 to vector<1x1xf32>
    %106 = arith.mulf %105, %104 : vector<1x1xf32>
    %c0_22 = arith.constant 0 : index
    %c0_23 = arith.constant 0 : index
    %107 = vector.load %arg9[%c0_22, %c0_23] : memref<1x1xf32, #tpu.memory_space<vmem>>, vector<1x1xf32>
    %108 = arith.addf %107, %71 : vector<1x1xf32>
    %c0_24 = arith.constant 0 : index
    %c0_25 = arith.constant 0 : index
    %109 = vector.load %arg9[%c0_24, %c0_25] : memref<1x1xf32, #tpu.memory_space<vmem>>, vector<1x1xf32>
    tpu.vector_store %arg9[%c0_24, %c0_25], %108 {strides = array<i32>} : memref<1x1xf32, #tpu.memory_space<vmem>>, vector<1x1xf32>,
    %c0_26 = arith.constant 0 : index
    %c0_27 = arith.constant 0 : index
    %110 = vector.load %arg10[%c0_26, %c0_27] : memref<1x1xf32, #tpu.memory_space<vmem>>, vector<1x1xf32>
    %111 = arith.addf %110, %85 : vector<1x1xf32>
    %c0_28 = arith.constant 0 : index
    %c0_29 = arith.constant 0 : index
    %112 = vector.load %arg10[%c0_28, %c0_29] : memref<1x1xf32, #tpu.memory_space<vmem>>, vector<1x1xf32>
    tpu.vector_store %arg10[%c0_28, %c0_29], %111 {strides = array<i32>} : memref<1x1xf32, #tpu.memory_space<vmem>>, vector<1x1xf32>,
    %c0_30 = arith.constant 0 : index
    %c0_31 = arith.constant 0 : index
    %113 = vector.load %arg11[%c0_30, %c0_31] : memref<1x1xf32, #tpu.memory_space<vmem>>, vector<1x1xf32>
    %114 = arith.addf %113, %106 : vector<1x1xf32>
    %c0_32 = arith.constant 0 : index
    %c0_33 = arith.constant 0 : index
    %115 = vector.load %arg11[%c0_32, %c0_33] : memref<1x1xf32, #tpu.memory_space<vmem>>, vector<1x1xf32>
    tpu.vector_store %arg11[%c0_32, %c0_33], %114 {strides = array<i32>} : memref<1x1xf32, #tpu.memory_space<vmem>>, vector<1x1xf32>,
    %c0_i32_34 = arith.constant 0 : i32
    %116 = arith.cmpi eq, %arg1, %c0_i32_34 : i32
    %117 = arith.extui %116 : i1 to i32
    %c0_i32_35 = arith.constant 0 : i32
    %118 = arith.cmpi ne, %117, %c0_i32_35 : i32
    scf.if %118 {
      %c0_36 = arith.constant 0 : index
      %c0_37 = arith.constant 0 : index
      %119 = vector.load %arg9[%c0_36, %c0_37] : memref<1x1xf32, #tpu.memory_space<vmem>>, vector<1x1xf32>
      %120 = vector.shape_cast %119 : vector<1x1xf32> to vector<1x1x1xf32>
      %c0_38 = arith.constant 0 : index
      %c0_39 = arith.constant 0 : index
      %c0_40 = arith.constant 0 : index
      %121 = vector.load %arg6[%c0_38, %c0_39, %c0_40] : memref<1x1x1xf32, #tpu.memory_space<vmem>>, vector<1x1x1xf32>
      tpu.vector_store %arg6[%c0_38, %c0_39, %c0_40], %120 {strides = array<i32>} : memref<1x1x1xf32, #tpu.memory_space<vmem>>, vector<1x1x1xf32>,
      %c0_41 = arith.constant 0 : index
      %c0_42 = arith.constant 0 : index
      %122 = vector.load %arg10[%c0_41, %c0_42] : memref<1x1xf32, #tpu.memory_space<vmem>>, vector<1x1xf32>
      %123 = vector.shape_cast %122 : vector<1x1xf32> to vector<1x1x1xf32>
      %c0_43 = arith.constant 0 : index
      %c0_44 = arith.constant 0 : index
      %c0_45 = arith.constant 0 : index
      %124 = vector.load %arg7[%c0_43, %c0_44, %c0_45] : memref<1x1x1xf32, #tpu.memory_space<vmem>>, vector<1x1x1xf32>
      tpu.vector_store %arg7[%c0_43, %c0_44, %c0_45], %123 {strides = array<i32>} : memref<1x1x1xf32, #tpu.memory_space<vmem>>, vector<1x1x1xf32>,
      %c0_46 = arith.constant 0 : index
      %c0_47 = arith.constant 0 : index
      %125 = vector.load %arg11[%c0_46, %c0_47] : memref<1x1xf32, #tpu.memory_space<vmem>>, vector<1x1xf32>
      %126 = vector.shape_cast %125 : vector<1x1xf32> to vector<1x1x1xf32>
      %c0_48 = arith.constant 0 : index
      %c0_49 = arith.constant 0 : index
      %c0_50 = arith.constant 0 : index
      %127 = vector.load %arg8[%c0_48, %c0_49, %c0_50] : memref<1x1x1xf32, #tpu.memory_space<vmem>>, vector<1x1x1xf32>
      tpu.vector_store %arg8[%c0_48, %c0_49, %c0_50], %126 {strides = array<i32>} : memref<1x1x1xf32, #tpu.memory_space<vmem>>, vector<1x1x1xf32>,
    } else {
    }
    return
  }
  func.func @transform_0(%arg0: i32, %arg1: i32) -> (i32, i32) {
    %c1_i32 = arith.constant 1 : i32
    %0 = arith.muli %arg0, %c1_i32 : i32
    %1 = arith.addi %0, %arg1 : i32
    %c0_i32 = arith.constant 0 : i32
    %c0_i32_0 = arith.constant 0 : i32
    return %1, %c0_i32 : i32, i32
  }
  func.func @transform_1(%arg0: i32, %arg1: i32) -> (i32, i32) {
    %c1_i32 = arith.constant 1 : i32
    %0 = arith.muli %arg0, %c1_i32 : i32
    %1 = arith.addi %0, %arg1 : i32
    %c0_i32 = arith.constant 0 : i32
    %c0_i32_0 = arith.constant 0 : i32
    return %1, %c0_i32 : i32, i32
  }
  func.func @transform_2(%arg0: i32, %arg1: i32) -> (i32, i32) {
    %c0_i32 = arith.constant 0 : i32
    %c0_i32_0 = arith.constant 0 : i32
    %c0_i32_1 = arith.constant 0 : i32
    return %c0_i32, %c0_i32_0 : i32, i32
  }
  func.func @transform_3(%arg0: i32, %arg1: i32) -> (i32, i32) {
    %c0_i32 = arith.constant 0 : i32
    %c0_i32_0 = arith.constant 0 : i32
    %c0_i32_1 = arith.constant 0 : i32
    return %c0_i32, %c0_i32_0 : i32, i32
  }
  func.func @transform_4(%arg0: i32, %arg1: i32) -> (i32, i32, i32) {
    %c0_i32 = arith.constant 0 : i32
    %c0_i32_0 = arith.constant 0 : i32
    %c0_i32_1 = arith.constant 0 : i32
    return %arg0, %c0_i32, %c0_i32_0 : i32, i32, i32
  }
  func.func @transform_5(%arg0: i32, %arg1: i32) -> (i32, i32, i32) {
    %c0_i32 = arith.constant 0 : i32
    %c0_i32_0 = arith.constant 0 : i32
    %c0_i32_1 = arith.constant 0 : i32
    return %arg0, %c0_i32, %c0_i32_0 : i32, i32, i32
  }
  func.func @transform_6(%arg0: i32, %arg1: i32) -> (i32, i32, i32) {
    %c0_i32 = arith.constant 0 : i32
    %c0_i32_0 = arith.constant 0 : i32
    %c0_i32_1 = arith.constant 0 : i32
    return %arg0, %c0_i32, %c0_i32_0 : i32, i32, i32
  }
}

</mosaic_0001>

<bundles_post_ra>
// kernel: a_call__.1
= control target key start
LH: loop header
LB: loop body
LE: loop exit
PB: predicated region body
PF: predicated region fallthrough
CT: control target
= control target key end

     0   :  { %12 = vsyncpa [#allocation6], 0  ;;  %v510_v9 = vlaneseq  ;;  %s1898_s0 = inlined_call_operand.vmem [shape: bf16[40,256], index: 0, kind: input, shape index: {}]   ;;  %s1899_s1 = inlined_call_operand.vmem [shape: bf16[40,256], index: 1, kind: input, shape index: {}]   ;;  %s1900_s2 = inlined_call_operand.vmem [shape: bf16[256,256], index: 2, kind: input, shape index: {}]   ;;  %s1901_s3 = inlined_call_operand.vmem [shape: f32[1,256], index: 3, kind: input, shape index: {}]   ;;  %s1902_s4 = inlined_call_operand.hbm [shape: f32[1,1,1], index: 4, kind: output, shape index: {0}]   ;;  %s1903_s5 = inlined_call_operand.hbm [shape: f32[1,1,1], index: 5, kind: output, shape index: {1}]   ;;  %s1904_s6 = inlined_call_operand.hbm [shape: f32[1,1,1], index: 6, kind: output, shape index: {2}]  }
   0x1   :  { %v1096_v0 = vld [vmem:[%s1900_s2 + $0x4] ss:$8 sps:$4 sm:$0xff]   ;;  %v1098_v1 = vld [vmem:[%s1900_s2] ss:$8 sps:$4 sm:$0xff]   ;;  %v1099_v2 = vld [vmem:[%s1900_s2 + $0x14] ss:$8 sps:$4 sm:$0xff]  }
   0x2   :  { %310 = vmatprep.subr.bf16.mxu0 %v1096_v0  ;;  %398 = vmatprep.subr.bf16.mxu1 %v1096_v0  ;;  %v1101_v3 = vld [vmem:[%s1900_s2 + $0x10] ss:$8 sps:$4 sm:$0xff]   ;;  %v1102_v4 = vld [vmem:[%s1900_s2 + $0x24] ss:$8 sps:$4 sm:$0xff]   ;;  %v1104_v5 = vld [vmem:[%s1900_s2 + $0x20] ss:$8 sps:$4 sm:$0xff]  }
   0x3   :  { %311 = vmatpush1.bf16.msra.mxu0 %v1098_v1  ;;  %399 = vmatpush1.bf16.msra.mxu1 %v1098_v1  ;;  %v1105_v6 = vld [vmem:[%s1900_s2 + $0x34] ss:$8 sps:$4 sm:$0xff]   ;;  %v1107_v7 = vld [vmem:[%s1900_s2 + $0x30] ss:$8 sps:$4 sm:$0xff]   ;;  %v1108_v8 = vld [vmem:[%s1900_s2 + $0x44] ss:$8 sps:$4 sm:$0xff]  }
   0x4   :  { %312 = vmatprep.subr.bf16.mxu0 %v1099_v2  ;;  %400 = vmatprep.subr.bf16.mxu1 %v1099_v2  ;;  %v1110_v10 = vld [vmem:[%s1900_s2 + $0x40] ss:$8 sps:$4 sm:$0xff]   ;;  %v1111_v11 = vld [vmem:[%s1900_s2 + $0x54] ss:$8 sps:$4 sm:$0xff]   ;;  %v1378_v12 = vshrl.u32 %v510_v9, 7 }
   0x5   :  { %v1113_v13 = vld [vmem:[%s1900_s2 + $0x50] ss:$8 sps:$4 sm:$0xff]   ;;  %v1114_v14 = vld [vmem:[%s1900_s2 + $0x64] ss:$8 sps:$4 sm:$0xff]   ;;  %v1116_v22 = vld [vmem:[%s1900_s2 + $0x60] ss:$8 sps:$4 sm:$0xff]  }
   0x6   :  { %v1389_v15 = vld [vmem:[%s1898_s0] sm:$0xff]  ;;  %v1394_v16 = vld [vmem:[%s1898_s0 + $0x8] sm:$0xff]  ;;  %v512_v20 = vsub.s32 0, %v1378_v12  ;;  %v516_v21 = vsub.s32 1, %v1378_v12  ;;  %v1117_v24 = vld [vmem:[%s1900_s2 + $0x74] ss:$8 sps:$4 sm:$0xff]  }
   0x7   :  { %313 = vmatpush1.bf16.msra.mxu0 %v1101_v3  ;;  %401 = vmatpush1.bf16.msra.mxu1 %v1101_v3  ;;  %v1036_v17 = vcombine.high %v1389_v15, %v1394_v16  ;;  %v1401_v18 = vld [vmem:[%s1899_s1] sm:$0xff]  ;;  %v1406_v19 = vld [vmem:[%s1899_s1 + $0x8] sm:$0xff]  ;;  %v499_v28 = vunpack.c.l.bf16 %v1389_v15  ;;  %v500_v29 = vunpack.c.h.bf16 %v1389_v15 }
   0x8   :  { %314 = vmatprep.subr.bf16.mxu0 %v1102_v4  ;;  %402 = vmatprep.subr.bf16.mxu1 %v1102_v4  ;;  %v1074_v23 = vcombine.high %v1401_v18, %v1406_v19  ;;  %v122_v25 = vld [vmem:[%s1901_s3] sm:$0x3]  ;;  %v545_v26 = vunpack.c.l.bf16 %v1401_v18  ;;  %v546_v27 = vunpack.c.h.bf16 %v1401_v18  ;;  %v547_v30 = vunpack.c.l.bf16 %v1406_v19 }
   0x9   :  { %342 = vmatprep.mubr.bf16.mxu0 %v1036_v17  ;;  %v548_v31 = vunpack.c.h.bf16 %v1406_v19 }
   0xa   :  { %430 = vmatprep.mubr.bf16.mxu1 %v1074_v23 }
   0xb   :  { %315 = vmatpush1.bf16.msra.mxu0 %v1104_v5  ;;  %403 = vmatpush1.bf16.msra.mxu1 %v1104_v5 }
   0xc   :  { %316 = vmatprep.subr.bf16.mxu0 %v1105_v6  ;;  %404 = vmatprep.subr.bf16.mxu1 %v1105_v6 }
   0xf   :  { %317 = vmatpush1.bf16.msra.mxu0 %v1107_v7  ;;  %405 = vmatpush1.bf16.msra.mxu1 %v1107_v7 }
  0x10   :  { %318 = vmatprep.subr.bf16.mxu0 %v1108_v8  ;;  %406 = vmatprep.subr.bf16.mxu1 %v1108_v8 }
  0x13   :  { %319 = vmatpush1.bf16.msra.mxu0 %v1110_v10  ;;  %407 = vmatpush1.bf16.msra.mxu1 %v1110_v10 }
  0x14   :  { %320 = vmatprep.subr.bf16.mxu0 %v1111_v11  ;;  %408 = vmatprep.subr.bf16.mxu1 %v1111_v11 }
  0x17   :  { %321 = vmatpush1.bf16.msra.mxu0 %v1113_v13  ;;  %409 = vmatpush1.bf16.msra.mxu1 %v1113_v13 }
  0x18   :  { %322 = vmatprep.subr.bf16.mxu0 %v1114_v14  ;;  %410 = vmatprep.subr.bf16.mxu1 %v1114_v14 }
  0x19   :  { %13 = vsyncpa [#allocation8], 0  ;;  %v1430_v32 = vld [vmem:[%s1899_s1 + $0x10] sm:$0xff]  ;;  %v1432_v33 = vrot.slane %v122_v25, %v512_v20  ;;  %v1434_v34 = vrot.slane %v122_v25, %v516_v21  ;;  %v501_v37 = vunpack.c.l.bf16 %v1394_v16  ;;  %v502_v38 = vunpack.c.h.bf16 %v1394_v16  ;;  %v1120_v41 = vld [vmem:[%s1900_s2 + $0x84] ss:$8 sps:$4 sm:$0xff]   ;;  %s1307_s10 = smov [#allocation5]  }
  0x1a   :  { %v1119_v35 = vld [vmem:[%s1900_s2 + $0x70] ss:$8 sps:$4 sm:$0xff]   ;;  %v549_v39 = vunpack.c.l.bf16 %v1430_v32  ;;  %v550_v40 = vunpack.c.h.bf16 %v1430_v32  ;;  %v1122_v52 = vld [vmem:[%s1900_s2 + $0x80] ss:$8 sps:$4 sm:$0xff]   ;;  %v1123_v58 = vld [vmem:[%s1900_s2 + $0x94] ss:$8 sps:$4 sm:$0xff]  }
  0x1b   :  { %323 = vmatpush1.bf16.msra.mxu0 %v1116_v22  ;;  %411 = vmatpush1.bf16.msra.mxu1 %v1116_v22  ;;  %v1442_v36 = vld [vmem:[%s1898_s0 + $0x10] sm:$0xff]  ;;  %v555_v42 = vmul.f32 %v545_v26, %v1432_v33  ;;  %v556_v43 = vmul.f32 %v546_v27, %v1434_v34  ;;  %v520_v44 = vmul.f32 %v1432_v33, %v499_v28  ;;  %v1466_v53 = vld [vmem:[%s1899_s1 + $0x18] sm:$0xff]  ;;  %v1488_v4 = vld [vmem:[%s1899_s1 + $0x20] sm:$0xff]  ;;  %vm803_vm0 = vcmask 7168   ;;  %s988_s11 = sshll.u32 %s1307_s10, 4  ;;  %s1308_s1 = smov [#allocation7]   ;;  %s989_s11 = int_to_ptr.vmem [resolvable:$true] %s988_s11 }
  0x1c   :  { %324 = vmatprep.subr.bf16.mxu0 %v1117_v24  ;;  %412 = vmatprep.subr.bf16.mxu1 %v1117_v24  ;;  %v503_v45 = vunpack.c.l.bf16 %v1442_v36  ;;  %v521_v46 = vmul.f32 %v1434_v34, %v500_v29  ;;  %v557_v47 = vmul.f32 %v547_v30, %v1432_v33  ;;  %v558_v48 = vmul.f32 %v548_v31, %v1434_v34  ;;  %v1477_v59 = vld [vmem:[%s1898_s0 + $0x18] sm:$0xff]  ;;  %v1496_v6 = vld [vmem:[%s1898_s0 + $0x20] sm:$0xff]  ;;  %s998_s12 = sshll.u32 %s1308_s1, 4  ;;  %s1236_s14 = scalar_lea.vmem %s989_s11, 16  ;;  %s1850_s12 = int_to_ptr.vmem [resolvable:$true] %s998_s12 }
  0x1d   :  { %v522_v49 = vmul.f32 %v1432_v33, %v501_v37  ;;  %v565_v50 = vadd.f32 %v556_v43, %v555_v42  ;;  %v523_v51 = vmul.f32 %v1434_v34, %v502_v38  ;;  %v559_v55 = vmul.f32 %v549_v39, %v1432_v33  ;;  %v1125_v5 = vld [vmem:[%s1900_s2 + $0x90] ss:$8 sps:$4 sm:$0xff]   ;;  %v1126_v9 = vld [vmem:[%s1900_s2 + $0xa4] ss:$8 sps:$4 sm:$0xff]   ;;  %v1128_v23 = vld [vmem:[%s1900_s2 + $0xa0] ss:$8 sps:$4 sm:$0xff]   ;;  %p1237_p0 = scmp.ne.s32.totalorder %s989_s11, %s1236_s14  ;;  %p1241_p1 = scmp.lt.s32.totalorder %s989_s11, %s989_s11 }
  0x1e   :  { %v530_v54 = vadd.f32 %v521_v46, %v520_v44  ;;  %v560_v56 = vmul.f32 %v550_v40, %v1434_v34  ;;  %v504_v57 = vunpack.c.h.bf16 %v1442_v36  ;;  %v568_v60 = vadd.f32 %v558_v48, %v557_v47  ;;  %v1129_v24 = vld [vmem:[%s1900_s2 + $0xb4] ss:$8 sps:$4 sm:$0xff]   ;;  %v1131_v31 = vld [vmem:[%s1900_s2 + $0xb0] ss:$8 sps:$4 sm:$0xff]   ;;  %v1138_v40 = vld [vmem:[%s1900_s2 + $0xe4] ss:$8 sps:$4 sm:$0xff]  }
  0x1f   :  { %325 = vmatpush1.bf16.msra.mxu0 %v1119_v35  ;;  %413 = vmatpush1.bf16.msra.mxu1 %v1119_v35  ;;  %v524_v61 = vmul.f32 %v1432_v33, %v503_v45  ;;  %v551_v62 = vunpack.c.l.bf16 %v1466_v53  ;;  %v552_v63 = vunpack.c.h.bf16 %v1466_v53  ;;  %v533_v0 = vadd.f32 %v523_v51, %v522_v49  ;;  %v1132_v35 = vld [vmem:[%s1900_s2 + $0xc4] ss:$8 sps:$4 sm:$0xff]   ;;  %v1137_v39 = vld [vmem:[%s1900_s2 + $0xd0] ss:$8 sps:$4 sm:$0xff]   ;;  %v1141_v42 = vld [vmem:[%s1900_s2 + $0xf4] ss:$8 sps:$4 sm:$0xff]  }
  0x20   :  { %326 = vmatprep.subr.bf16.mxu0 %v1120_v41  ;;  %414 = vmatprep.subr.bf16.mxu1 %v1120_v41  ;;  %v525_v1 = vmul.f32 %v1434_v34, %v504_v57  ;;  %v505_v2 = vunpack.c.l.bf16 %v1477_v59  ;;  %v506_v3 = vunpack.c.h.bf16 %v1477_v59  ;;  %v571_v7 = vadd.f32 %v560_v56, %v559_v55  ;;  %v1140_v41 = vld [vmem:[%s1900_s2 + $0xe0] ss:$8 sps:$4 sm:$0xff]   ;;  %v1143_v43 = vld [vmem:[%s1900_s2 + $0xf0] ss:$8 sps:$4 sm:$0xff]   ;;  %s1240_s3 = scalar_lea.vmem %s989_s11, 32 }
  0x21   :  { %566 = vadd.xlane.f32.xlu1 %v565_v50  ;;  %531 = vadd.xlane.f32.xlu0 %v530_v54  ;;  %v553_v8 = vunpack.c.l.bf16 %v1488_v4  ;;  %v561_v10 = vmul.f32 %v551_v62, %v1432_v33  ;;  %v562_v11 = vmul.f32 %v552_v63, %v1434_v34  ;;  %v554_v13 = vunpack.c.h.bf16 %v1488_v4  ;;  %p1242_p2 = scmp.lt.s32.totalorder %s1240_s3, %s1236_s14 }
  0x22   :  { %v507_v14 = vunpack.c.l.bf16 %v1496_v6  ;;  %v536_v17 = vadd.f32 %v525_v1, %v524_v61  ;;  %v526_v20 = vmul.f32 %v1432_v33, %v505_v2  ;;  %v527_v21 = vmul.f32 %v1434_v34, %v506_v3 }
  0x23   :  { %327 = vmatpush1.bf16.msra.mxu0 %v1122_v52  ;;  %415 = vmatpush1.bf16.msra.mxu1 %v1122_v52  ;;  %v508_v22 = vunpack.c.h.bf16 %v1496_v6  ;;  %v574_v25 = vadd.f32 %v562_v11, %v561_v10  ;;  %v563_v26 = vmul.f32 %v553_v8, %v1432_v33  ;;  %v564_v27 = vmul.f32 %v554_v13, %v1434_v34  ;;  %p1243_p3 = por %p1242_p2, %p1241_p1 }
  0x24   :  { %328 = vmatprep.subr.bf16.mxu0 %v1123_v58  ;;  %416 = vmatprep.subr.bf16.mxu1 %v1123_v58  ;;  %v539_v28 = vadd.f32 %v527_v21, %v526_v20  ;;  %v528_v29 = vmul.f32 %v1432_v33, %v507_v14  ;;  %v1134_v33 = vld [vmem:[%s1900_s2 + $0xc0] ss:$8 sps:$4 sm:$0xff]   ;;  %v1035_v44 = vcombine.low %v1389_v15, %v1394_v16  ;;  %v757_v54 = vadd.s32 32, %v1378_v12 }
  0x25   :  { %569 = vadd.xlane.f32.xlu1 %v568_v60  ;;  %534 = vadd.xlane.f32.xlu0 %v533_v0  ;;  %v529_v30 = vmul.f32 %v1434_v34, %v508_v22  ;;  %v577_v37 = vadd.f32 %v564_v27, %v563_v26  ;;  %v1135_v34 = vld [vmem:[%s1900_s2 + $0xd4] ss:$8 sps:$4 sm:$0xff]   ;;  %v1073_v45 = vcombine.low %v1401_v18, %v1406_v19  ;;  %v1306_v2 = vmov 0.0   ;;  %p1244_p4 = pnand %p1243_p3, %p1237_p0 }
  0x26   :  { %v1038_v46 = vcombine.high %v1442_v36, %v1477_v59  ;;  %v1076_v47 = vcombine.high %v1430_v32, %v1466_v53  ;;  %v1037_v48 = vcombine.low %v1442_v36, %v1477_v59  ;;  %v1075_v15 = vcombine.low %v1430_v32, %v1466_v53 }
  0x27   :  { %329 = vmatpush1.bf16.msra.mxu0 %v1125_v5  ;;  %417 = vmatpush1.bf16.msra.mxu1 %v1125_v5  ;;  %v542_v38 = vadd.f32 %v529_v30, %v528_v29  ;;  %v1040_v16 = vcombine.high %v1496_v6, %v1496_v6  ;;  %v1078_v18 = vcombine.high %v1488_v4, %v1488_v4  ;;  %vm768_vm1 = vcmp.lt.s32.totalorder %v757_v54, 34 }
  0x28   :  { %330 = vmatprep.subr.bf16.mxu0 %v1126_v9  ;;  %418 = vmatprep.subr.bf16.mxu1 %v1126_v9  ;;  %v1039_v19 = vcombine.low %v1496_v6, %v1496_v6  ;;  %v1077_v49 = vcombine.low %v1488_v4, %v1488_v4  ;;  %v1583_v3 = vsel %vm768_vm1, 1.0, %v1306_v2 }
  0x29   :  { %572 = vadd.xlane.f32.xlu1 %v571_v7  ;;  %537 = vadd.xlane.f32.xlu0 %v536_v17 }
  0x2b   :  { %331 = vmatpush1.bf16.msra.mxu0 %v1128_v23  ;;  %419 = vmatpush1.bf16.msra.mxu1 %v1128_v23 }
  0x2c   :  { %332 = vmatprep.subr.bf16.mxu0 %v1129_v24  ;;  %420 = vmatprep.subr.bf16.mxu1 %v1129_v24 }
  0x2d   :  { %575 = vadd.xlane.f32.xlu1 %v574_v25  ;;  %540 = vadd.xlane.f32.xlu0 %v539_v28 }
  0x2f   :  { %333 = vmatpush1.bf16.msra.mxu0 %v1131_v31  ;;  %421 = vmatpush1.bf16.msra.mxu1 %v1131_v31 }
  0x30   :  { %334 = vmatprep.subr.bf16.mxu0 %v1132_v35  ;;  %422 = vmatprep.subr.bf16.mxu1 %v1132_v35 }
  0x31   :  { %578 = vadd.xlane.f32.xlu1 %v577_v37  ;;  %543 = vadd.xlane.f32.xlu0 %v542_v38 }
  0x33   :  { %335 = vmatpush1.bf16.msra.mxu0 %v1134_v33  ;;  %423 = vmatpush1.bf16.msra.mxu1 %v1134_v33 }
  0x34   :  { %336 = vmatprep.subr.bf16.mxu0 %v1135_v34  ;;  %424 = vmatprep.subr.bf16.mxu1 %v1135_v34 }
  0x37   :  { %337 = vmatpush1.bf16.msra.mxu0 %v1137_v39  ;;  %425 = vmatpush1.bf16.msra.mxu1 %v1137_v39 }
  0x38   :  { %338 = vmatprep.subr.bf16.mxu0 %v1138_v40  ;;  %426 = vmatprep.subr.bf16.mxu1 %v1138_v40 }
  0x3b   :  { %339 = vmatpush1.bf16.msra.mxu0 %v1140_v41  ;;  %427 = vmatpush1.bf16.msra.mxu1 %v1140_v41 }
  0x3c   :  { %340 = vmatprep.subr.bf16.mxu0 %v1141_v42  ;;  %428 = vmatprep.subr.bf16.mxu1 %v1141_v42 }
  0x3f   :  { %341 = vmatpush1.bf16.msra.mxu0 %v1143_v43  ;;  %429 = vmatpush1.bf16.msra.mxu1 %v1143_v43 }
  0x42   :  { %343 = vmatmul.mubr.bf16.vlgmr.msra.gmra.mrb[0].mxu0 %v1035_v44  ;;  %431 = vmatmul.mubr.bf16.vlgmr.msra.gmra.mrb[0].mxu1 %v1073_v45 }
  0x43   :  { %352 = vmatprep.mubr.bf16.mxu0 %v1038_v46  ;;  %440 = vmatprep.mubr.bf16.mxu1 %v1076_v47 }
  0x4a   :  { %353 = vmatmul.mubr.bf16.gmra.mrb[4].mxu0 %v1037_v48  ;;  %441 = vmatmul.mubr.bf16.gmra.mrb[4].mxu1 %v1075_v15 }
  0x4b   :  { %362 = vmatprep.mubr.bf16.mxu0 %v1040_v16  ;;  %450 = vmatprep.mubr.bf16.mxu1 %v1078_v18 }
  0x52   :  { %363 = vmatmul.mubr.bf16.gmra.mrb[8].mxu0 %v1039_v19  ;;  %451 = vmatmul.mubr.bf16.gmra.mrb[8].mxu1 %v1077_v49 }
  0xae   :  { %v567_v36 = vpop.xlane.xlu1 %566  ;;  %v532_v32 = vpop.xlane.xlu0 %531 }
  0xaf   :  { %v590_v50 = vmul.f32 %v567_v36, %v567_v36  ;;  %v580_v51 = vmul.f32 %v532_v32, %v532_v32 }
  0xb1   :  { %v1566_v52 = vmax.f32 %v590_v50, 1e-06  ;;  %v1568_v53 = vmax.f32 %v580_v51, 1e-06 }
  0xb2   :  { %v570_v55 = vpop.xlane.xlu1 %569  ;;  %v535_v56 = vpop.xlane.xlu0 %534 }
  0xb3   :  { %1156 = vrsqrt.f32 %v1568_v53  ;;  %v591_v57 = vmul.f32 %v570_v55, %v570_v55  ;;  %v581_v58 = vmul.f32 %v535_v56, %v535_v56  ;;  %v848_v63 = vsel %vm803_vm0, %v1566_v52, 0.0 }
  0xb4   :  { %1158 = vrsqrt.f32 %v1566_v52  ;;  %vm672_vm2 = vcmp.eq.f32.partialorder %v1568_v53, inf  ;;  %vm674_vm3 = vcmp.eq.f32.partialorder %v1568_v53, 0.0  ;;  %v675_v9 = vand.u32 2147483648, %v1568_v53 }
  0xb5   :  { %v1572_v59 = vmax.f32 %v591_v57, 1e-06  ;;  %v1574_v60 = vmax.f32 %v581_v58, 1e-06  ;;  %vm707_vm4 = vcmp.eq.f32.partialorder %v1566_v52, inf  ;;  %vm709_vm5 = vcmp.eq.f32.partialorder %v1566_v52, 0.0 }
  0xb6   :  { %v573_v61 = vpop.xlane.xlu1 %572  ;;  %v538_v62 = vpop.xlane.xlu0 %537  ;;  %v710_v14 = vand.u32 2147483648, %v1566_v52 }
  0xb7   :  { %1160 = vrsqrt.f32 %v1574_v60  ;;  %v592_v12 = vmul.f32 %v573_v61, %v573_v61  ;;  %v582_v0 = vmul.f32 %v538_v62, %v538_v62  ;;  %v849_v1 = vsel %vm803_vm0, %v1572_v59, 0.0 }
  0xb8   :  { %v850_v6 = vadd.f32 %v849_v1, %v848_v63  ;;  %1162 = vrsqrt.f32 %v1572_v59  ;;  %vm679_vm6 = vcmp.eq.f32.partialorder %v1574_v60, inf  ;;  %vm681_vm7 = vcmp.eq.f32.partialorder %v1574_v60, 0.0 }
  0xb9   :  { %v1586_v4 = vmax.f32 %v592_v12, 1e-06  ;;  %v1588_v5 = vmax.f32 %v582_v0, 1e-06  ;;  %v682_v26 = vand.u32 2147483648, %v1574_v60  ;;  %vm714_vm8 = vcmp.eq.f32.partialorder %v1572_v59, inf }
  0xba   :  { %v576_v7 = vpop.xlane.xlu1 %575  ;;  %v541_v8 = vpop.xlane.xlu0 %540  ;;  %vm716_vm9 = vcmp.eq.f32.partialorder %v1572_v59, 0.0  ;;  %v717_v31 = vand.u32 2147483648, %v1572_v59 }
  0xbb   :  { %1164 = vrsqrt.f32 %v1588_v5  ;;  %v593_v10 = vmul.f32 %v576_v7, %v576_v7  ;;  %v583_v11 = vmul.f32 %v541_v8, %v541_v8  ;;  %v851_v13 = vsel %vm803_vm0, %v1586_v4, 0.0 }
  0xbc   :  { %1166 = vlog2.f32 %v1566_v52  ;;  %v852_v22 = vadd.f32 %v851_v13, %v850_v6  ;;  %vm686_vm10 = vcmp.eq.f32.partialorder %v1588_v5, inf  ;;  %vm688_vm11 = vcmp.eq.f32.partialorder %v1588_v5, 0.0 }
  0xbd   :  { %v1157_v17 = vpop.eup %1156  ;;  %v1602_v20 = vmax.f32 %v593_v10, 1e-06  ;;  %v1604_v21 = vmax.f32 %v583_v11, 1e-06  ;;  %1168 = vrsqrt.f32 %v1586_v4  ;;  %v689_v34 = vand.u32 2147483648, %v1588_v5 }
  0xbe   :  { %v579_v23 = vpop.xlane.xlu1 %578  ;;  %v544_v24 = vpop.xlane.xlu0 %543  ;;  %v671_v25 = vmul.f32 %v1157_v17, %v1568_v53  ;;  %vm721_vm12 = vcmp.eq.f32.partialorder %v1586_v4, inf  ;;  %vm723_vm13 = vcmp.eq.f32.partialorder %v1586_v4, 0.0  ;;  %v724_v47 = vand.u32 2147483648, %v1586_v4 }
  0xbf   :  { %v1159_v27 = vpop.eup %1158  ;;  %1170 = vrsqrt.f32 %v1604_v21  ;;  %v594_v28 = vmul.f32 %v579_v23, %v579_v23  ;;  %v584_v29 = vmul.f32 %v544_v24, %v544_v24  ;;  %v853_v30 = vsel %vm803_vm0, %v1602_v20, 0.0 }
  0xc0   :  { %1172 = vlog2.f32 %v1572_v59  ;;  %v854_v33 = vadd.f32 %v853_v30, %v852_v22  ;;  %v673_v39 = vsel %vm672_vm2, %v1568_v53, %v671_v25  ;;  %v706_v41 = vmul.f32 %v1159_v27, %v1566_v52 }
  0xc1   :  { %v1161_v35 = vpop.eup %1160  ;;  %v1618_v37 = vmax.f32 %v594_v28, 1e-06  ;;  %v1620_v38 = vmax.f32 %v584_v29, 1e-06  ;;  %1174 = vrsqrt.f32 %v1602_v20  ;;  %v676_v16 = vsel %vm674_vm3, %v675_v9, %v673_v39 }
  0xc2   :  { %v678_v40 = vmul.f32 %v1161_v35, %v1574_v60  ;;  %v1163_v42 = vpop.eup %1162  ;;  %v708_v45 = vsel %vm707_vm4, %v1566_v52, %v706_v41  ;;  %vm693_vm14 = vcmp.eq.f32.partialorder %v1604_v21, inf  ;;  %vm695_vm15 = vcmp.eq.f32.partialorder %v1604_v21, 0.0 }
  0xc3   :  { %v847_v43 = vmul.f32 %v1583_v3, %v1618_v37  ;;  %1176 = vrsqrt.f32 %v1620_v38  ;;  %v713_v46 = vmul.f32 %v1163_v42, %v1572_v59  ;;  %v711_v18 = vsel %vm709_vm5, %v710_v14, %v708_v45 }
  0xc4   :  { %v680_v44 = vsel %vm679_vm6, %v1574_v60, %v678_v40  ;;  %1178 = vlog2.f32 %v1586_v4  ;;  %v696_v55 = vand.u32 2147483648, %v1604_v21  ;;  %v745_v57 = vsub.f32 %v711_v18, %v676_v16 }
  0xc5   :  { %v1165_v48 = vpop.eup %1164  ;;  %v855_v15 = vsel %vm803_vm0, %v847_v43, 0.0  ;;  %v683_v36 = vsel %vm681_vm7, %v682_v26, %v680_v44  ;;  %v715_v50 = vsel %vm714_vm8, %v1572_v59, %v713_v46  ;;  %1180 = vrsqrt.f32 %v1618_v37 }
  0xc6   :  { %v1648_v19 = vpop.eup %1166  ;;  %v856_v49 = vadd.f32 %v855_v15, %v854_v33  ;;  %v685_v32 = vmul.f32 %v1165_v48, %v1588_v5  ;;  %v718_v52 = vsel %vm716_vm9, %v717_v31, %v715_v50  ;;  %vm700_vm1 = vcmp.eq.f32.partialorder %v1620_v38, inf }
  0xc7   :  { %v1169_v51 = vpop.eup %1168  ;;  %vm728_vm2 = vcmp.eq.f32.partialorder %v1602_v20, inf  ;;  %v746_v59 = vsub.f32 %v718_v52, %v683_v36  ;;  %vm702_vm3 = vcmp.eq.f32.partialorder %v1620_v38, 0.0  ;;  %v798_v0 = vmul.f32 %v745_v57, %v745_v57 }
  0xc8   :  { %857 = vadd.xlane.f32.xlu1 %v856_v49  ;;  %v687_v54 = vsel %vm686_vm10, %v1588_v5, %v685_v32  ;;  %v720_v56 = vmul.f32 %v1169_v51, %v1586_v4  ;;  %v731_v6 = vand.u32 2147483648, %v1602_v20  ;;  %1182 = vlog2.f32 %v1602_v20 }
  0xc9   :  { %v1171_v58 = vpop.eup %1170  ;;  %v690_v61 = vsel %vm688_vm11, %v689_v34, %v687_v54  ;;  %v799_v7 = vmul.f32 %v746_v59, %v746_v59  ;;  %v804_v11 = vsel %vm803_vm0, %v798_v0, 0.0  ;;  %1184 = vlog2.f32 %v1618_v37 }
  0xca   :  { %v1173_v62 = vpop.eup %1172  ;;  %v692_v63 = vmul.f32 %v1171_v58, %v1604_v21  ;;  %v722_v12 = vsel %vm721_vm12, %v1586_v4, %v720_v56  ;;  %vm730_vm4 = vcmp.eq.f32.partialorder %v1602_v20, 0.0  ;;  %1186 = vlog2.f32 %v1568_v53 }
  0xcb   :  { %v725_v1 = vsel %vm723_vm13, %v724_v47, %v722_v12  ;;  %v1175_v8 = vpop.eup %1174  ;;  %v805_v4 = vsel %vm803_vm0, %v799_v7, 0.0  ;;  %1188 = vlog2.f32 %v1574_v60  ;;  %v703_v25 = vand.u32 2147483648, %v1620_v38 }
  0xcc   :  { %v694_v9 = vsel %vm693_vm14, %v1604_v21, %v692_v63  ;;  %v747_v10 = vsub.f32 %v725_v1, %v690_v61  ;;  %v727_v14 = vmul.f32 %v1175_v8, %v1602_v20  ;;  %v806_v27 = vadd.f32 %v805_v4, %v804_v11 }
  0xcd   :  { %v1177_v13 = vpop.eup %1176  ;;  %v697_v17 = vsel %vm695_vm15, %v696_v55, %v694_v9  ;;  %1190 = vlog2.f32 %v1588_v5  ;;  %vm735_vm5 = vcmp.eq.f32.partialorder %v1618_v37, inf  ;;  %v738_v30 = vand.u32 2147483648, %v1618_v37 }
  0xce   :  { %v699_v22 = vmul.f32 %v1177_v13, %v1620_v38  ;;  %v800_v23 = vmul.f32 %v747_v10, %v747_v10  ;;  %v1179_v24 = vpop.eup %1178  ;;  %v729_v26 = vsel %vm728_vm2, %v1602_v20, %v727_v14  ;;  %1192 = vlog2.f32 %v1604_v21 }
  0xcf   :  { %v732_v28 = vsel %vm730_vm4, %v731_v6, %v729_v26  ;;  %v1181_v60 = vpop.eup %1180  ;;  %1194 = vlog2.f32 %v1620_v38  ;;  %vm737_vm6 = vcmp.eq.f32.partialorder %v1618_v37, 0.0  ;;  %v913_v43 = vmul.f32 0.6931472, %v1648_v19 }
  0xd0   :  { %v701_v53 = vsel %vm700_vm1, %v1620_v38, %v699_v22  ;;  %v807_v29 = vsel %vm803_vm0, %v800_v23, 0.0  ;;  %v748_v31 = vsub.f32 %v732_v28, %v697_v17  ;;  %v734_v20 = vmul.f32 %v1181_v60, %v1618_v37 }
  0xd1   :  { %v704_v5 = vsel %vm702_vm3, %v703_v25, %v701_v53  ;;  %v808_v33 = vadd.f32 %v807_v29, %v806_v27  ;;  %v915_v46 = vmul.f32 0.6931472, %v1173_v62  ;;  %v917_v15 = vmul.f32 0.6931472, %v1179_v24 }
  0xd2   :  { %v801_v35 = vmul.f32 %v748_v31, %v748_v31  ;;  %v736_v34 = vsel %vm735_vm5, %v1618_v37, %v734_v20  ;;  %v1183_v21 = vpop.eup %1182 }
  0xd3   :  { %v739_v39 = vsel %vm737_vm6, %v738_v30, %v736_v34  ;;  %v1185_v41 = vpop.eup %1184  ;;  %v919_v18 = vmul.f32 0.6931472, %v1183_v21 }
  0xd4   :  { %v809_v40 = vsel %vm803_vm0, %v801_v35, 0.0  ;;  %v749_v42 = vsub.f32 %v739_v39, %v704_v5  ;;  %v1187_v44 = vpop.eup %1186  ;;  %v921_v32 = vmul.f32 0.6931472, %v1185_v41 }
  0xd5   :  { %v810_v45 = vadd.f32 %v809_v40, %v808_v33  ;;  %v1189_v47 = vpop.eup %1188  ;;  %v923_v38 = vmul.f32 0.6931472, %v1187_v44 }
  0xd6   :  { %v802_v48 = vmul.f32 %v749_v42, %v749_v42  ;;  %v925_v49 = vmul.f32 0.6931472, %v1189_v47 }
  0xd7   :  { %v1191_v16 = vpop.eup %1190  ;;  %v932_v51 = vsub.f32 %v913_v43, %v923_v38 }
  0xd8   :  { %v1193_v36 = vpop.eup %1192  ;;  %v811_v37 = vsel %vm803_vm0, %v802_v48, 0.0  ;;  %v927_v50 = vmul.f32 0.6931472, %v1191_v16  ;;  %v933_v19 = vsub.f32 %v915_v46, %v925_v49 }
  0xd9   :  { %v1195_v52 = vpop.eup %1194  ;;  %v812_v54 = vadd.f32 %v811_v37, %v810_v45  ;;  %v929_v55 = vmul.f32 0.6931472, %v1193_v36  ;;  %v937_v58 = vand.u32 2147483647, %v932_v51 }
  0xda   :  { %v931_v56 = vmul.f32 0.6931472, %v1195_v52  ;;  %v934_v57 = vsub.f32 %v917_v15, %v927_v50  ;;  %v938_v59 = vand.u32 2147483647, %v933_v19 }
  0xdb   :  { %813 = vadd.xlane.f32.xlu1 %v812_v54  ;;  %v935_v61 = vsub.f32 %v919_v18, %v929_v55  ;;  %v942_v12 = vsel %vm803_vm0, %v937_v58, 0.0 }
  0xdc   :  { %v936_v62 = vsub.f32 %v921_v32, %v931_v56  ;;  %v939_v63 = vand.u32 2147483647, %v934_v57  ;;  %v943_v1 = vsel %vm803_vm0, %v938_v59, 0.0 }
  0xdd   :  { %v940_v0 = vand.u32 2147483647, %v935_v61  ;;  %v944_v7 = vadd.f32 %v943_v1, %v942_v12 }
  0xde   :  { %v941_v6 = vand.u32 2147483647, %v936_v62  ;;  %v945_v8 = vsel %vm803_vm0, %v939_v63, 0.0 }
  0xdf   :  { %v947_v9 = vsel %vm803_vm0, %v940_v0, 0.0  ;;  %v946_v10 = vadd.f32 %v945_v8, %v944_v7 }
  0xe0   :  { %v949_v11 = vsel %vm803_vm0, %v941_v6, 0.0 }
  0xe1   :  { %v948_v13 = vadd.f32 %v947_v9, %v946_v10 }
  0xe3   :  { %v950_v14 = vadd.f32 %v949_v11, %v948_v13 }
  0xe5   :  { %951 = vadd.xlane.f32.xlu1 %v950_v14 }
 0x115   :  { %v344_v4 = vpop.f32.mrb[0].mxu0  ;;  %v432_v17 = vpop.f32.mrb[0].mxu1 }
 0x116   :  { %v459_v22 = vmul.f32 %v344_v4, %v344_v4  ;;  %v479_v23 = vmul.f32 %v432_v17, %v432_v17  ;;  %v346_v24 = vpop.f32.mrb[1].mxu0  ;;  %v434_v25 = vpop.f32.mrb[1].mxu1 }
 0x117   :  { %v464_v26 = vmul.f32 %v346_v24, %v346_v24  ;;  %v484_v27 = vmul.f32 %v434_v25, %v434_v25  ;;  %v348_v53 = vpop.f32.mrb[2].mxu0  ;;  %v436_v28 = vpop.f32.mrb[2].mxu1 }
 0x118   :  { %v460_v29 = vmul.f32 %v348_v53, %v348_v53  ;;  %v480_v60 = vmul.f32 %v436_v28, %v436_v28  ;;  %v350_v30 = vpop.f32.mrb[3].mxu0  ;;  %v438_v31 = vpop.f32.mrb[3].mxu1 }
 0x119   :  { %v469_v20 = vadd.f32 %v464_v26, %v459_v22  ;;  %v489_v5 = vadd.f32 %v484_v27, %v479_v23  ;;  %v465_v35 = vmul.f32 %v350_v30, %v350_v30  ;;  %v485_v33 = vmul.f32 %v438_v31, %v438_v31 }
 0x11b   :  { %v1718_v34 = vmax.f32 %v469_v20, 1e-06  ;;  %v470_v21 = vadd.f32 %v465_v35, %v460_v29  ;;  %v490_v39 = vadd.f32 %v485_v33, %v480_v60  ;;  %v1720_v40 = vmax.f32 %v489_v5, 1e-06 }
 0x11d   :  { %1196 = vrsqrt.f32 %v1718_v34  ;;  %v1723_v41 = vmax.f32 %v470_v21, 1e-06  ;;  %v1725_v42 = vmax.f32 %v490_v39, 1e-06  ;;  %v354_v43 = vpop.f32.mrb[4].mxu0  ;;  %v442_v44 = vpop.f32.mrb[4].mxu1 }
 0x11e   :  { %v461_v45 = vmul.f32 %v354_v43, %v354_v43  ;;  %v481_v46 = vmul.f32 %v442_v44, %v442_v44  ;;  %v356_v47 = vpop.f32.mrb[5].mxu0  ;;  %v444_v48 = vpop.f32.mrb[5].mxu1  ;;  %vm602_vm0 = vcmp.eq.f32.partialorder %v1718_v34, inf  ;;  %vm604_vm7 = vcmp.eq.f32.partialorder %v1718_v34, 0.0 }
 0x11f   :  { %1198 = vrsqrt.f32 %v1723_v41  ;;  %v466_v15 = vmul.f32 %v356_v47, %v356_v47  ;;  %v486_v38 = vmul.f32 %v444_v48, %v444_v48  ;;  %v358_v16 = vpop.f32.mrb[6].mxu0  ;;  %v446_v18 = vpop.f32.mrb[6].mxu1  ;;  %v829_v49 = vadd.f32 %v1725_v42, %v1720_v40 }
 0x120   :  { %v462_v36 = vmul.f32 %v358_v16, %v358_v16  ;;  %v482_v37 = vmul.f32 %v446_v18, %v446_v18  ;;  %v360_v32 = vpop.f32.mrb[7].mxu0  ;;  %v448_v50 = vpop.f32.mrb[7].mxu1  ;;  %1200 = vrsqrt.f32 %v1720_v40  ;;  %v605_v23 = vand.u32 2147483648, %v1718_v34 }
 0x121   :  { %v471_v51 = vadd.f32 %v466_v15, %v461_v45  ;;  %v491_v52 = vadd.f32 %v486_v38, %v481_v46  ;;  %v467_v54 = vmul.f32 %v360_v32, %v360_v32  ;;  %v487_v55 = vmul.f32 %v448_v50, %v448_v50 }
 0x122   :  { %1202 = vrsqrt.f32 %v1725_v42  ;;  %vm609_vm8 = vcmp.eq.f32.partialorder %v1723_v41, inf  ;;  %vm611_vm9 = vcmp.eq.f32.partialorder %v1723_v41, 0.0  ;;  %v612_v53 = vand.u32 2147483648, %v1723_v41 }
 0x123   :  { %v1731_v19 = vmax.f32 %v471_v51, 1e-06  ;;  %v1733_v56 = vmax.f32 %v491_v52, 1e-06  ;;  %v472_v57 = vadd.f32 %v467_v54, %v462_v36  ;;  %v492_v58 = vadd.f32 %v487_v55, %v482_v37 }
 0x124   :  { %vm637_vm10 = vcmp.eq.f32.partialorder %v1720_v40, inf  ;;  %vm639_vm11 = vcmp.eq.f32.partialorder %v1720_v40, 0.0  ;;  %v640_v60 = vand.u32 2147483648, %v1720_v40  ;;  %vm644_vm13 = vcmp.eq.f32.partialorder %v1725_v42, inf }
 0x125   :  { %v1736_v61 = vmax.f32 %v472_v57, 1e-06  ;;  %v1738_v59 = vmax.f32 %v492_v58, 1e-06  ;;  %v364_v62 = vpop.f32.mrb[8].mxu0  ;;  %v452_v63 = vpop.f32.mrb[8].mxu1  ;;  %v830_v12 = vadd.f32 %v829_v49, %v1733_v56  ;;  %1204 = vrsqrt.f32 %v1731_v19 }
 0x126   :  { %v463_v0 = vmul.f32 %v364_v62, %v364_v62  ;;  %v483_v1 = vmul.f32 %v452_v63, %v452_v63  ;;  %v366_v6 = vpop.f32.mrb[9].mxu0  ;;  %v454_v7 = vpop.f32.mrb[9].mxu1  ;;  %vm616_vm12 = vcmp.eq.f32.partialorder %v1731_v19, inf  ;;  %vm618_vm14 = vcmp.eq.f32.partialorder %v1731_v19, 0.0 }
 0x127   :  { %v1197_v8 = vpop.eup %1196  ;;  %v468_v9 = vmul.f32 %v366_v6, %v366_v6  ;;  %v488_v10 = vmul.f32 %v454_v7, %v454_v7  ;;  %v368_v11 = vpop.f32.mrb[10].mxu0  ;;  %v831_v14 = vadd.f32 %v830_v12, %v1738_v59  ;;  %1206 = vrsqrt.f32 %v1736_v61 }
 0x128   :  { %v456_v13 = vpop.f32.mrb[10].mxu1  ;;  %v369_v4 = vpop.f32.mrb[11].mxu0  ;;  %v601_v22 = vmul.f32 %v1197_v8, %v1718_v34  ;;  %1208 = vrsqrt.f32 %v1733_v56  ;;  %v619_v33 = vand.u32 2147483648, %v1731_v19  ;;  %vm623_vm15 = vcmp.eq.f32.partialorder %v1736_v61, inf }
 0x129   :  { %v457_v17 = vpop.f32.mrb[11].mxu1  ;;  %v1199_v24 = vpop.eup %1198  ;;  %v473_v25 = vadd.f32 %v468_v9, %v463_v0  ;;  %v493_v26 = vadd.f32 %v488_v10, %v483_v1  ;;  %1210 = vrsqrt.f32 %v1738_v59  ;;  %v626_v21 = vand.u32 2147483648, %v1736_v61 }
 0x12a   :  { %v608_v27 = vmul.f32 %v1199_v24, %v1723_v41  ;;  %v1201_v30 = vpop.eup %1200  ;;  %v603_v31 = vsel %vm602_vm0, %v1718_v34, %v601_v22  ;;  %vm625_vm1 = vcmp.eq.f32.partialorder %v1736_v61, 0.0  ;;  %v647_v46 = vand.u32 2147483648, %v1725_v42 }
 0x12b   :  { %v1754_v28 = vmax.f32 %v473_v25, 1e-06  ;;  %v1756_v29 = vmax.f32 %v493_v26, 1e-06  ;;  %v636_v39 = vmul.f32 %v1201_v30, %v1720_v40  ;;  %vm646_vm2 = vcmp.eq.f32.partialorder %v1725_v42, 0.0 }
 0x12c   :  { %v610_v5 = vsel %vm609_vm8, %v1723_v41, %v608_v27  ;;  %v1203_v35 = vpop.eup %1202  ;;  %vm651_vm3 = vcmp.eq.f32.partialorder %v1733_v56, inf  ;;  %vm653_vm4 = vcmp.eq.f32.partialorder %v1733_v56, 0.0  ;;  %v654_v52 = vand.u32 2147483648, %v1733_v56 }
 0x12d   :  { %v828_v20 = vmul.f32 %v1583_v3, %v1756_v29  ;;  %1212 = vrsqrt.f32 %v1754_v28  ;;  %v606_v3 = vsel %vm604_vm7, %v605_v23, %v603_v31  ;;  %v643_v45 = vmul.f32 %v1203_v35, %v1725_v42 }
 0x12e   :  { %v613_v47 = vsel %vm611_vm9, %v612_v53, %v610_v5  ;;  %v638_v15 = vsel %vm637_vm10, %v1720_v40, %v636_v39  ;;  %1214 = vrsqrt.f32 %v1756_v29  ;;  %vm630_vm5 = vcmp.eq.f32.partialorder %v1754_v28, inf }
 0x12f   :  { %v1205_v43 = vpop.eup %1204  ;;  %v832_v44 = vadd.f32 %v831_v14, %v828_v20  ;;  %v641_v38 = vsel %vm639_vm11, %v640_v60, %v638_v15  ;;  %v645_v16 = vsel %vm644_vm13, %v1725_v42, %v643_v45  ;;  %1216 = vlog2.f32 %v1720_v40 }
 0x130   :  { %v615_v48 = vmul.f32 %v1205_v43, %v1731_v19  ;;  %v648_v49 = vsel %vm646_vm2, %v647_v46, %v645_v16  ;;  %v740_v36 = vsub.f32 %v641_v38, %v606_v3  ;;  %1218 = vlog2.f32 %v1725_v42 }
 0x131   :  { %833 = vadd.xlane.f32.xlu0 %v832_v44  ;;  %v1207_v18 = vpop.eup %1206  ;;  %v741_v50 = vsub.f32 %v648_v49, %v613_v47  ;;  %1220 = vlog2.f32 %v1733_v56  ;;  %vm658_vm6 = vcmp.eq.f32.partialorder %v1738_v59, inf  ;;  %v661_v62 = vand.u32 2147483648, %v1738_v59 }
 0x132   :  { %v617_v37 = vsel %vm616_vm12, %v1731_v19, %v615_v48  ;;  %v622_v32 = vmul.f32 %v1207_v18, %v1736_v61  ;;  %v1209_v51 = vpop.eup %1208  ;;  %v779_v54 = vmul.f32 %v740_v36, %v740_v36  ;;  %1222 = vlog2.f32 %v1738_v59 }
 0x133   :  { %v650_v55 = vmul.f32 %v1209_v51, %v1733_v56  ;;  %v780_v57 = vmul.f32 %v741_v50, %v741_v50  ;;  %v1211_v58 = vpop.eup %1210  ;;  %v620_v42 = vsel %vm618_vm14, %v619_v33, %v617_v37  ;;  %1224 = vlog2.f32 %v1756_v29 }
 0x134   :  { %v624_v40 = vsel %vm623_vm15, %v1736_v61, %v622_v32  ;;  %v657_v0 = vmul.f32 %v1211_v58, %v1738_v59  ;;  %1226 = vlog2.f32 %v1718_v34  ;;  %vm660_vm0 = vcmp.eq.f32.partialorder %v1738_v59, 0.0 }
 0x135   :  { %v652_v12 = vsel %vm651_vm3, %v1733_v56, %v650_v55  ;;  %v784_v1 = vadd.f32 %v780_v57, %v779_v54  ;;  %v627_v6 = vsel %vm625_vm1, %v626_v21, %v624_v40  ;;  %1228 = vlog2.f32 %v1723_v41 }
 0x136   :  { %v655_v8 = vsel %vm653_vm4, %v654_v52, %v652_v12  ;;  %v659_v9 = vsel %vm658_vm6, %v1738_v59, %v657_v0  ;;  %1230 = vlog2.f32 %v1731_v19  ;;  %v633_v13 = vand.u32 2147483648, %v1754_v28 }
 0x137   :  { %v1213_v63 = vpop.eup %1212  ;;  %v742_v10 = vsub.f32 %v655_v8, %v620_v42  ;;  %v662_v14 = vsel %vm660_vm0, %v661_v62, %v659_v9  ;;  %1232 = vlog2.f32 %v1736_v61  ;;  %vm632_vm7 = vcmp.eq.f32.partialorder %v1754_v28, 0.0 }
 0x138   :  { %v629_v7 = vmul.f32 %v1213_v63, %v1754_v28  ;;  %v1215_v11 = vpop.eup %1214  ;;  %v743_v56 = vsub.f32 %v662_v14, %v627_v6  ;;  %vm665_vm8 = vcmp.eq.f32.partialorder %v1756_v29, inf  ;;  %v668_v19 = vand.u32 2147483648, %v1756_v29 }
 0x139   :  { %v664_v41 = vmul.f32 %v1215_v11, %v1756_v29  ;;  %v781_v4 = vmul.f32 %v742_v10, %v742_v10  ;;  %v1217_v59 = vpop.eup %1216  ;;  %1234 = vlog2.f32 %v1754_v28  ;;  %vm667_vm9 = vcmp.eq.f32.partialorder %v1756_v29, 0.0 }
 0x13a   :  { %v631_v34 = vsel %vm630_vm5, %v1754_v28, %v629_v7  ;;  %v1219_v22 = vpop.eup %1218  ;;  %v782_v61 = vmul.f32 %v743_v56, %v743_v56  ;;  %v869_v31 = vmul.f32 0.6931472, %v1217_v59  ;;  %vm76_vm10 = vcmask 0  }
 0x13b   :  { %v634_v17 = vsel %vm632_vm7, %v633_v13, %v631_v34  ;;  %v666_v23 = vsel %vm665_vm8, %v1756_v29, %v664_v41  ;;  %v785_v24 = vadd.f32 %v784_v1, %v781_v4  ;;  %v1221_v25 = vpop.eup %1220  ;;  %v871_v35 = vmul.f32 0.6931472, %v1219_v22  ;;  %77 = vst.msk [vmem:[#allocation2] sm:$0x1] %vm76_vm10, %v1306_v2  ;;  %78 = vst.msk [vmem:[#allocation3] sm:$0x1] %vm76_vm10, %v1306_v2 }
 0x13c   :  { %v669_v26 = vsel %vm667_vm9, %v668_v19, %v666_v23  ;;  %v1223_v27 = vpop.eup %1222  ;;  %v873_v21 = vmul.f32 0.6931472, %v1221_v25  ;;  %79 = vst.msk [vmem:[#allocation4] sm:$0x1] %vm76_vm10, %v1306_v2 }
 0x13d   :  { %v744_v53 = vsub.f32 %v669_v26, %v634_v17  ;;  %v786_v60 = vadd.f32 %v785_v24, %v782_v61  ;;  %v1225_v30 = vpop.eup %1224  ;;  %v875_v44 = vmul.f32 0.6931472, %v1223_v27 }
 0x13e   :  { %v1227_v20 = vpop.eup %1226  ;;  %v877_v47 = vmul.f32 0.6931472, %v1225_v30 }
 0x13f   :  { %v783_v5 = vmul.f32 %v744_v53, %v744_v53  ;;  %v1229_v33 = vpop.eup %1228  ;;  %v879_v28 = vmul.f32 0.6931472, %v1227_v20 }
 0x140   :  { %v1231_v39 = vpop.eup %1230  ;;  %v881_v3 = vmul.f32 0.6931472, %v1229_v33 }
 0x141   :  { %v787_v43 = vadd.f32 %v786_v60, %v783_v5  ;;  %v1233_v29 = vpop.eup %1232  ;;  %v883_v45 = vmul.f32 0.6931472, %v1231_v39  ;;  %v888_v46 = vsub.f32 %v869_v31, %v879_v28 }
 0x142   :  { %v885_v48 = vmul.f32 0.6931472, %v1233_v29  ;;  %v889_v15 = vsub.f32 %v871_v35, %v881_v3  ;;  %v963_v29 = vld [vmem:[#allocation2] sm:$0x1] }
 0x143   :  { %788 = vadd.xlane.f32.xlu0 %v787_v43  ;;  %v1235_v38 = vpop.eup %1234  ;;  %v890_v16 = vsub.f32 %v873_v21, %v883_v45  ;;  %v893_v36 = vand.u32 2147483647, %v888_v46 }
 0x144   :  { %v887_v18 = vmul.f32 0.6931472, %v1235_v38  ;;  %v891_v49 = vsub.f32 %v875_v44, %v885_v48  ;;  %v894_v37 = vand.u32 2147483647, %v889_v15  ;;  %v967_v48 = vld [vmem:[#allocation3] sm:$0x1] }
 0x145   :  { %v895_v32 = vand.u32 2147483647, %v890_v16 }
 0x146   :  { %v892_v50 = vsub.f32 %v877_v47, %v887_v18  ;;  %v896_v51 = vand.u32 2147483647, %v891_v49  ;;  %v898_v52 = vadd.f32 %v894_v37, %v893_v36 }
 0x148   :  { %v897_v54 = vand.u32 2147483647, %v892_v50  ;;  %v899_v40 = vadd.f32 %v898_v52, %v895_v32  ;;  %v970_v32 = vld [vmem:[#allocation4] sm:$0x1] }
 0x14a   :  { %v900_v55 = vadd.f32 %v899_v40, %v896_v51 }
 0x14c   :  { %v901_v57 = vadd.f32 %v900_v55, %v897_v54 }
 0x14e   :  { %902 = vadd.xlane.f32.xlu0 %v901_v57 }
 0x155   :  { %v858_v58 = vpop.xlane.xlu1 %857 }
 0x156   :  { %v859_v0 = vrot.slane %v858_v58, 4 }
 0x158   :  { %v860_v7 = vadd.f32 %v859_v0, %v858_v58 }
 0x15a   :  { %v861_v13 = vrot.slane %v860_v7, 2 }
 0x15c   :  { %v862_v59 = vadd.f32 %v861_v13, %v860_v7 }
 0x15e   :  { %v863_v24 = vrot.slane %v862_v59, 1 }
 0x160   :  { %v864_v31 = vadd.f32 %v863_v24, %v862_v59 }
 0x168   :  { %v814_v42 = vpop.xlane.xlu1 %813 }
 0x169   :  { %v815_v63 = vrot.slane %v814_v42, 4 }
 0x16b   :  { %v816_v1 = vadd.f32 %v815_v63, %v814_v42 }
 0x16d   :  { %v817_v8 = vrot.slane %v816_v1, 2 }
 0x16f   :  { %v818_v56 = vadd.f32 %v817_v8, %v816_v1 }
 0x171   :  { %v819_v22 = vrot.slane %v818_v56, 1 }
 0x172   :  { %v952_v10 = vpop.xlane.xlu1 %951 }
 0x173   :  { %v953_v41 = vrot.slane %v952_v10, 4  ;;  %v820_v53 = vadd.f32 %v819_v22, %v818_v56 }
 0x175   :  { %v954_v19 = vadd.f32 %v953_v41, %v952_v10 }
 0x177   :  { %v955_v26 = vrot.slane %v954_v19, 2 }
 0x179   :  { %v956_v5 = vadd.f32 %v955_v26, %v954_v19 }
 0x17b   :  { %v957_v21 = vrot.slane %v956_v5, 1 }
 0x17d   :  { %v958_v43 = vadd.f32 %v957_v21, %v956_v5 }
 0x1be   :  { %v834_v62 = vpop.xlane.xlu0 %833 }
 0x1bf   :  { %v835_v12 = vrot.slane %v834_v62, 4 }
 0x1c1   :  { %v836_v6 = vadd.f32 %v835_v12, %v834_v62 }
 0x1c3   :  { %v837_v11 = vrot.slane %v836_v6, 2 }
 0x1c5   :  { %v838_v2 = vadd.f32 %v837_v11, %v836_v6 }
 0x1c7   :  { %v839_v61 = vrot.slane %v838_v2, 1 }
 0x1c9   :  { %v840_v30 = vadd.f32 %v839_v61, %v838_v2 }
 0x1d0   :  { %v789_v9 = vpop.xlane.xlu0 %788 }
 0x1d1   :  { %v790_v34 = vrot.slane %v789_v9, 4 }
 0x1d3   :  { %v791_v14 = vadd.f32 %v790_v34, %v789_v9 }
 0x1d5   :  { %v792_v4 = vrot.slane %v791_v14, 2 }
 0x1d7   :  { %v793_v17 = vadd.f32 %v792_v4, %v791_v14 }
 0x1d9   :  { %v794_v23 = vrot.slane %v793_v17, 1 }
 0x1db   :  { %v795_v25 = vadd.f32 %v794_v23, %v793_v17  ;;  %v903_v27 = vpop.xlane.xlu0 %902 }
 0x1dc   :  { %v904_v60 = vrot.slane %v903_v27, 4 }
 0x1dd   :  { %1080 = vpush %v795_v25 }
 0x1de   :  { %1082 = vpush %v820_v53  ;;  %v905_v20 = vadd.f32 %v904_v60, %v903_v27 }
 0x1df   :  { %1084 = vpush %v840_v30 }
 0x1e0   :  { %1086 = vpush %v864_v31  ;;  %v906_v35 = vrot.slane %v905_v20, 2 }
 0x1e2   :  { %v907_v33 = vadd.f32 %v906_v35, %v905_v20 }
 0x1e4   :  { %v908_v28 = vrot.slane %v907_v33, 1 }
 0x1e6   :  { %v909_v39 = vadd.f32 %v908_v28, %v907_v33 }
 0x1e8   :  { %1088 = vpush %v909_v39 }
 0x1e9   :  { %1090 = vpush %v958_v43 }
 0x20e   :  { %s1081_s2 = spop %1080 }
 0x20f   :  { %v797_v44 = vstv %s1081_s2  ;;  %s1083_s7 = spop %1082 }
 0x210   :  { %v822_v3 = vstv %s1083_s7  ;;  %s1085_s8 = spop %1084 }
 0x211   :  { %v823_v45 = vadd.f32 %v822_v3, %v797_v44  ;;  %v842_v46 = vstv %s1085_s8  ;;  %s1087_s9 = spop %1086 }
 0x212   :  { %v866_v47 = vstv %s1087_s9 }
 0x213   :  { %v964_v15 = vadd.f32 %v963_v29, %v823_v45  ;;  %v867_v38 = vadd.f32 %v866_v47, %v842_v46 }
 0x215   :  { %966 = vst.msk [vmem:[#allocation2] sm:$0x1] %vm76_vm10, %v964_v15  ;;  %v968_v16 = vadd.f32 %v967_v48, %v867_v38 }
 0x217   :  { %969 = vst.msk [vmem:[#allocation3] sm:$0x1] %vm76_vm10, %v968_v16 }
 0x219   :  { %s1089_s0 = spop %1088 }
 0x21a   :  { %v911_v18 = vstv %s1089_s0  ;;  %s1091_s13 = spop %1090 }
 0x21b   :  { %v960_v49 = vstv %s1091_s13 }
 0x21c   :  { %v976_v36 = vld [vmem:[#allocation2] sm:$0x1]  ;;  %v961_v37 = vadd.f32 %v960_v49, %v911_v18 }
 0x21d   :  { %977 = vst.msk [vmem:[#allocation5] sm:$0x1] %vm76_vm10, %v976_v36 }
 0x21e   :  { %v978_v50 = vld [vmem:[#allocation3] sm:$0x1] }
 0x21f   :  { %1247 = shalt.err (!%p1244_p4)
}
 0x220   :  { %s1248_s17 = scalar_lea.hbm %s1902_s4, 16 }
 0x221   :  { %p1249_p5 = scmp.ne.s32.totalorder %s1902_s4, %s1248_s17  ;;  %p1252_p6 = scmp.lt.u32.totalorder %s1248_s17, %s1902_s4 }
 0x223   :  { %p1254_p7 = pnand %p1252_p6, %p1249_p5 }
 0x225   :  { %1257 = shalt.err (!%p1254_p7)
}
 0x226   :  { %991 = dma.vmem_to_hbm [thread:$0]  %s989_s11, 16, %s1902_s4, [#allocation6]   ;;  %v962_v51 = vmul.f32 0.5, %v961_v37  ;;  %979 = vst.msk [vmem:[#allocation7] sm:$0x1] %vm76_vm10, %v978_v50 }
 0x227   :  { %s1258_s24 = scalar_lea.vmem %s1850_s12, 16  ;;  %s1262_s25 = scalar_lea.vmem %s1850_s12, 32 }
 0x228   :  { %p1259_p8 = scmp.ne.s32.totalorder %s1850_s12, %s1258_s24  ;;  %p1263_p9 = scmp.lt.s32.totalorder %s1850_s12, %s1850_s12 }
 0x229   :  { %p1264_p10 = scmp.lt.s32.totalorder %s1262_s25, %s1258_s24 }
 0x22b   :  { %p1265_p11 = por %p1264_p10, %p1263_p9 }
 0x22d   :  { %p1266_p12 = pnand %p1265_p11, %p1259_p8 }
 0x22f   :  { %1269 = shalt.err (!%p1266_p12)
}
 0x230   :  { %s1270_s28 = scalar_lea.hbm %s1903_s5, 16 }
 0x231   :  { %p1271_p13 = scmp.ne.s32.totalorder %s1903_s5, %s1270_s28  ;;  %p1274_p0 = scmp.lt.u32.totalorder %s1270_s28, %s1903_s5 }
 0x233   :  { %p1276_p1 = pnand %p1274_p0, %p1271_p13 }
 0x235   :  { %1279 = shalt.err (!%p1276_p1)
}
 0x236   :  { %1001 = dma.vmem_to_hbm [thread:$0]  %s1850_s12, 16, %s1903_s5, [#allocation8]   ;;  %v971_v52 = vadd.f32 %v970_v32, %v962_v51 }
 0x237   :  { %s1309_s9 = smov [#allocation9]  }
 0x238   :  { %972 = vst.msk [vmem:[#allocation4] sm:$0x1] %vm76_vm10, %v971_v52  ;;  %s1008_s10 = sshll.u32 %s1309_s9, 4  ;;  %s1009_s10 = int_to_ptr.vmem [resolvable:$true] %s1008_s10 }
 0x239   :  { %s1280_s11 = scalar_lea.vmem %s1009_s10, 16  ;;  %s1284_s0 = scalar_lea.vmem %s1009_s10, 32 }
 0x23a   :  { %p1281_p2 = scmp.ne.s32.totalorder %s1009_s10, %s1280_s11  ;;  %p1285_p3 = scmp.lt.s32.totalorder %s1009_s10, %s1009_s10 }
 0x23b   :  { %p1286_p4 = scmp.lt.s32.totalorder %s1284_s0, %s1280_s11 }
 0x23d   :  { %p1287_p5 = por %p1286_p4, %p1285_p3 }
 0x23f   :  { %v980_v54 = vld [vmem:[#allocation4] sm:$0x1]  ;;  %p1288_p6 = pnand %p1287_p5, %p1281_p2 }
 0x240   :  { %981 = vst.msk [vmem:[#allocation9] sm:$0x1] %vm76_vm10, %v980_v54 }
 0x241   :  { %1291 = shalt.err (!%p1288_p6)
}
 0x242   :  { %s1292_s5 = scalar_lea.hbm %s1904_s6, 16 }
 0x243   :  { %p1293_p7 = scmp.ne.s32.totalorder %s1904_s6, %s1292_s5  ;;  %p1296_p8 = scmp.lt.u32.totalorder %s1292_s5, %s1904_s6 }
 0x245   :  { %p1298_p9 = pnand %p1296_p8, %p1293_p7 }
 0x247   :  { %1301 = shalt.err (!%p1298_p9)
}
 0x248   :  { %1011 = dma.vmem_to_hbm [thread:$0]  %s1009_s10, 16, %s1904_s6, [#allocation8]  }
 0x249   :  { %1302 = dma.done.wait [#allocation6], 16  }
 0x24a   :  { %1303 = vsyncadd [#allocation6], 4294967280 }
 0x24b   :  { %1304 = dma.done.wait [#allocation8], 32  }
 0x24c   :  { %1305 = vsyncadd [#allocation8], 4294967264 }
 0x24d   :  { %1021 = vsyncpa [#allocation6], 1 }
 0x24e   :  { %1022 = vsyncpa [#allocation8], 1 }

</bundles_post_ra>
